<compile_context>
chip_gen: v7x
topology: tpu7x:2x2x1
jax: 0.10.0
libtpu: 0.0.40
codegen_flags: <defaults>
</compile_context>

<pallas_src>
import jax
import jax.numpy as jnp
from jax.experimental import pallas as pl
from jax.experimental.pallas import tpu as pltpu

ACTION_SPACE = 6
CH = 128                      # channel_cnn == channel_fc == 128
K = 4                         # conv kernel size
L = 8                         # sequence length implied by incoming_size
B = 2                         # per-step batch (matches module example)
LOUT_A = L - K + 1            # 5  (conv1 / conv2 output length)
LOUT_B = ACTION_SPACE - K + 1 # 3  (conv3 output length)
XW = 8                        # lane width of the x slab (K padded to 8)
NW = (2 * LOUT_A + LOUT_B) * B   # 26 window rows
XIN_ROWS = NW + B                # 28 (windows + scalar rows)
N_SEG = 2 * LOUT_A + LOUT_B + 3  # 16 fc1 input segments of 128 lanes

# ---- small f32 parameter slab row offsets (all rows 128 lanes wide) -------- #
CW_OFF = 0                    # 3 conv-weight blocks of 8 rows (taps 0..3 real)
CB_OFF = 24                   # 3 conv bias rows
FW_OFF = 27                   # 3 fc_small weight rows
FB_OFF = 30                   # 3 fc_small bias rows
B1_OFF = 33                   # fc1 bias row
B2_OFF = 34                   # fc2 bias row (pad lanes = -1e30)
PSM_ROWS = 40                 # padded to a multiple of 8


# ----------------------------- Pallas kernel ------------------------------ #
def actor_kernel(xin_ref, psm_ref, w1_ref, w2_ref, out_ref):
    # xin_ref: [28, 8]  f32  rows 0:10 conv1 windows (t-major), 10:20 conv2,
    #                        20:26 conv3, 26:28 last-step scalars (lanes 0..2)
    # psm_ref: [40, 128] f32 small slab (conv W/b, fc_small W/b, b1, b2 row)
    # w1_ref:  [2048, 128] bf16 fc1 weight, segment-major rows
    # w2_ref:  [128, 128]  bf16 fc2 weight, pad cols = 0
    # out_ref: [B, 128]    f32 full softmax row (pad lanes exactly 0)
    f32 = jnp.float32
    bf16 = jnp.bfloat16
    relu = lambda v: jnp.maximum(v, 0.0)

    xin = xin_ref[...]                                             # [28, 8] f32

    # --- conv1d(1, 128, 4) + ReLU as one im2col matmul per conv (f32) ------ #
    def conv(i, win):
        w = psm_ref[CW_OFF + 8 * i:CW_OFF + 8 * i + 8, :]          # [8, 128]
        b = psm_ref[CB_OFF + i:CB_OFF + i + 1, :]                  # [1, 128]
        return relu(jnp.dot(win, w, preferred_element_type=f32) + b)

    c1 = conv(0, xin[0:LOUT_A * B, :])                             # [5B, 128]
    c2 = conv(1, xin[LOUT_A * B:2 * LOUT_A * B, :])                # [5B, 128]
    c3 = conv(2, xin[2 * LOUT_A * B:NW, :])                        # [3B, 128]

    # --- Linear(1, 128) + ReLU on the last-step scalars (f32) -------------- #
    sc = xin[NW:NW + B, :]                                         # [B, 8]
    fsm = []
    for i in range(3):
        fw = psm_ref[FW_OFF + i:FW_OFF + i + 1, :]
        fb = psm_ref[FB_OFF + i:FB_OFF + i + 1, :]
        fsm.append(relu(sc[:, i:i + 1] * fw + fb))                 # [B, 128]

    # --- fc1: single [B, 2048] @ [2048, 128] matmul ------------------------ #
    # Lane-concat the 16 per-segment [B, 128] activations (same order as the
    # segment-major rows of w1_ref), then one MXU dot with f32 accumulation.
    blocks = ([c1[t * B:(t + 1) * B, :] for t in range(LOUT_A)]
              + [c2[t * B:(t + 1) * B, :] for t in range(LOUT_A)]
              + [c3[t * B:(t + 1) * B, :] for t in range(LOUT_B)]
              + fsm)
    feat = jnp.concatenate(blocks, axis=1)                         # [B, 2048] f32
    b1 = psm_ref[B1_OFF:B1_OFF + 1, :]                             # [1, 128]
    h = relu(jnp.dot(feat.astype(bf16), w1_ref[...],
                     preferred_element_type=f32) + b1)             # [B, 128] f32

    # --- fc2 + softmax, lane-padded to 128 (pad logits ~ -1e30) ------------ #
    b2 = psm_ref[B2_OFF:B2_OFF + 1, :]                             # [1, 128]
    logits = jnp.dot(h.astype(bf16), w2_ref[...],
                     preferred_element_type=f32) + b2              # [B, 128] f32
    m = jnp.max(logits, axis=1, keepdims=True)
    e = jnp.exp(logits - m)                                        # pads -> 0
    s = jnp.sum(e, axis=1, keepdims=True)
    out_ref[...] = e / s                                           # lane-dense store


# ------------------------ wrapper / layout plumbing ------------------------ #
def build_xin(x):
    # x: [T, B, 6, L] -> one lane-dense slab per step: [T, 28, 8]
    T = x.shape[0]

    def windows(row, lout):             # row [T, B, Lin] -> [T, lout*B, K], t-major
        w = jnp.stack([row[:, :, t:t + K] for t in range(lout)], axis=1)
        return w.reshape(T, lout * row.shape[1], K)

    win1 = windows(x[:, :, 2, :], LOUT_A)
    win2 = windows(x[:, :, 3, :], LOUT_A)
    win3 = windows(x[:, :, 4, :ACTION_SPACE], LOUT_B)
    wins = jnp.concatenate([win1, win2, win3], axis=1)             # [T, 26, 4]
    wins = jnp.pad(wins, ((0, 0), (0, 0), (0, XW - K)))            # [T, 26, 8]
    sc = jnp.stack([x[:, :, 0, -1], x[:, :, 1, -1], x[:, :, 5, -1]], axis=2)
    sc = jnp.pad(sc, ((0, 0), (0, 0), (0, XW - 3)))                # [T, B, 8]
    return jnp.concatenate([wins, sc], axis=1)                     # [T, 28, 8]


def actor_forward(x, params):
    """x: [T, B, 6, L] (rollout steps / actor instances stacked) or [B, 6, L]."""
    psm, w1, w2 = params
    squeeze_t = (x.ndim == 3)
    if squeeze_t:
        x = x[None]
    T = x.shape[0]
    xin = build_xin(x)

    out = pl.pallas_call(
        actor_kernel,
        out_shape=jax.ShapeDtypeStruct((T, B, CH), jnp.float32),
        grid=(T,),
        in_specs=[
            # per-step input slab
            pl.BlockSpec((None, XIN_ROWS, XW), lambda t: (t, 0, 0)),
            # parameters: constant block index -> fetched once, resident in VMEM
            pl.BlockSpec((PSM_ROWS, CH), lambda t: (0, 0)),
            pl.BlockSpec((N_SEG * CH, CH), lambda t: (0, 0)),
            pl.BlockSpec((CH, CH), lambda t: (0, 0)),
        ],
        out_specs=pl.BlockSpec((None, B, CH), lambda t: (t, 0, 0)),
        compiler_params=pltpu.CompilerParams(
            dimension_semantics=("parallel",)),
    )(xin, psm, w1, w2)

    out = out[:, :, :ACTION_SPACE]                                 # lane-dense -> 6
    return out[0] if squeeze_t else out


# ------------------------ parameter setup (plain JAX) ---------------------- #
def init_params(key):
    ks = jax.random.split(key, 16)
    s = 0.1
    cW1 = jax.random.normal(ks[0], (CH, 1, K), jnp.float32) * s
    cb1 = jax.random.normal(ks[1], (CH,), jnp.float32) * s
    cW2 = jax.random.normal(ks[2], (CH, 1, K), jnp.float32) * s
    cb2 = jax.random.normal(ks[3], (CH,), jnp.float32) * s
    cW3 = jax.random.normal(ks[4], (CH, 1, K), jnp.float32) * s
    cb3 = jax.random.normal(ks[5], (CH,), jnp.float32) * s
    fW1 = jax.random.normal(ks[6], (CH, 1), jnp.float32) * s
    fb1 = jax.random.normal(ks[7], (CH,), jnp.float32) * s
    fW2 = jax.random.normal(ks[8], (CH, 1), jnp.float32) * s
    fb2 = jax.random.normal(ks[9], (CH,), jnp.float32) * s
    fW3 = jax.random.normal(ks[10], (CH, 1), jnp.float32) * s
    fb3 = jax.random.normal(ks[11], (CH,), jnp.float32) * s
    incoming = 2 * CH * LOUT_A + CH * LOUT_B + 3 * CH               # 2048
    W1 = jax.random.normal(ks[12], (CH, incoming), jnp.float32) * 0.02
    b1 = jax.random.normal(ks[13], (CH,), jnp.float32) * s
    W2 = jax.random.normal(ks[14], (ACTION_SPACE, CH), jnp.float32) * s
    b2 = jax.random.normal(ks[15], (ACTION_SPACE,), jnp.float32) * s
    return (cW1, cb1, cW2, cb2, cW3, cb3,
            fW1, fb1, fW2, fb2, fW3, fb3, W1, b1, W2, b2)


def pack_kernel_params(raw):
    """Pack parameters into (psm_f32[40,128], w1_bf16[2048,128], w2_bf16[128,128])."""
    (cW1, cb1, cW2, cb2, cW3, cb3,
     fW1, fb1, fW2, fb2, fW3, fb3, W1, b1, W2, b2) = raw

    psm = jnp.zeros((PSM_ROWS, CH), jnp.float32)
    for i, (cW, cb) in enumerate([(cW1, cb1), (cW2, cb2), (cW3, cb3)]):
        psm = psm.at[CW_OFF + 8 * i:CW_OFF + 8 * i + K, :].set(cW[:, 0, :].T)
        psm = psm.at[CB_OFF + i, :].set(cb)
    for i, (fW, fb) in enumerate([(fW1, fb1), (fW2, fb2), (fW3, fb3)]):
        psm = psm.at[FW_OFF + i, :].set(fW[:, 0])
        psm = psm.at[FB_OFF + i, :].set(fb)
    psm = psm.at[B1_OFF, :].set(b1)
    b2row = jnp.full((CH,), -1e30, jnp.float32).at[:ACTION_SPACE].set(b2)
    psm = psm.at[B2_OFF, :].set(b2row)

    # fc1 weight, reorganized segment-major to match the in-kernel feat concat.
    # PyTorch flattens each conv output (channel, time)-major.
    w1 = jnp.zeros((N_SEG * CH, CH), jnp.float32)
    seg, off = 0, 0
    for lout in (LOUT_A, LOUT_A, LOUT_B):                           # conv1, conv2, conv3
        Wc = W1[:, off:off + CH * lout].reshape(CH, CH, lout)       # [o, c, t]
        for t in range(lout):
            w1 = w1.at[seg * CH:(seg + 1) * CH, :].set(Wc[:, :, t].T)
            seg += 1
        off += CH * lout
    for _ in range(3):                                              # fc_small segments
        w1 = w1.at[seg * CH:(seg + 1) * CH, :].set(W1[:, off:off + CH].T)
        seg += 1
        off += CH

    w2 = jnp.zeros((CH, CH), jnp.float32).at[:, :ACTION_SPACE].set(W2.T)

    return psm, w1.astype(jnp.bfloat16), w2.astype(jnp.bfloat16)


# ------------------------- pure-JAX reference (PyTorch semantics) ---------- #
def actor_reference(x, raw):
    (cW1, cb1, cW2, cb2, cW3, cb3,
     fW1, fb1, fW2, fb2, fW3, fb3, W1, b1, W2, b2) = raw

    def conv1d(xr, W, b):                 # xr [B, Lin], W [Cout,1,K], b [Cout]
        kk = W.shape[2]
        lout = xr.shape[1] - kk + 1
        cols = jnp.stack([xr[:, t:t + kk] for t in range(lout)], axis=1)  # [B,Lout,K]
        return jnp.einsum('blk,ck->bcl', cols, W[:, 0, :]) + b[None, :, None]

    bsz = x.shape[0]
    x1 = jax.nn.relu(conv1d(x[:, 2, :], cW1, cb1)).reshape(bsz, -1)
    x2 = jax.nn.relu(conv1d(x[:, 3, :], cW2, cb2)).reshape(bsz, -1)
    x3 = jax.nn.relu(conv1d(x[:, 4, :ACTION_SPACE], cW3, cb3)).reshape(bsz, -1)
    x4 = jax.nn.relu(x[:, 0, -1:] @ fW1.T + fb1)
    x5 = jax.nn.relu(x[:, 1, -1:] @ fW2.T + fb2)
    x6 = jax.nn.relu(x[:, 5, -1:] @ fW3.T + fb3)
    feat = jnp.concatenate([x1, x2, x3, x4, x5, x6], axis=1)
    h = jax.nn.relu(feat @ W1.T + b1)
    return jax.nn.softmax(h @ W2.T + b2, axis=1)


# --------------------------------- main ------------------------------------ #
if __name__ == "__main__":
    key = jax.random.PRNGKey(0)
    kp, kx = jax.random.split(key)
    raw = init_params(kp)
    params = pack_kernel_params(raw)

    T = 8                                              # rollout steps (grid axis)
    x = jax.random.normal(kx, (T, B, 6, L), jnp.float32)

    fwd = jax.jit(actor_forward)
    out = jax.block_until_ready(fwd(x, params))

    ref = actor_reference(x.reshape(T * B, 6, L), raw).reshape(T, B, ACTION_SPACE)
    assert out.shape == (T, B, ACTION_SPACE)
    assert jnp.allclose(jnp.sum(out, axis=-1), 1.0, atol=1e-4)
    # Tolerance relaxed vs. the pure-f32 reference because fc1/fc2 weights are bf16.
    assert jnp.allclose(out, ref, rtol=5e-2, atol=1e-2), (out, ref)

    print("KERNEL_OK")
</pallas_src>

<mosaic_0001>
module attributes {stable_mosaic.version = 11 : i64} {
  func.func @actor_kernel(%arg0: i32, %arg1: memref<1x28x8xf32, #tpu.memory_space<vmem>>, %arg2: memref<40x128xf32, #tpu.memory_space<vmem>>, %arg3: memref<2048x128xbf16, #tpu.memory_space<vmem>>, %arg4: memref<128x128xbf16, #tpu.memory_space<vmem>>, %arg5: memref<1x2x128xf32, #tpu.memory_space<vmem>>) attributes {dimension_semantics = [#tpu.dimension_semantics<parallel>], iteration_bounds = array<i64: 8>, scalar_prefetch = 0 : i64, scratch_operands = 0 : i64, tpu.core_type = #tpu.core_type<tc>, window_params = [{transform_indices = @transform_0, window_bounds = array<i64: 1, 28, 8>}, {pipeline_mode = #tpu.pipeline_mode<synchronous>, transform_indices = @transform_1, window_bounds = array<i64: 40, 128>}, {pipeline_mode = #tpu.pipeline_mode<synchronous>, transform_indices = @transform_2, window_bounds = array<i64: 2048, 128>}, {pipeline_mode = #tpu.pipeline_mode<synchronous>, transform_indices = @transform_3, window_bounds = array<i64: 128, 128>}, {transform_indices = @transform_4, window_bounds = array<i64: 1, 2, 128>}]} {
    %c0 = arith.constant 0 : index
    %c0_0 = arith.constant 0 : index
    %c0_1 = arith.constant 0 : index
    %0 = vector.load %arg1[%c0, %c0_0, %c0_1] : memref<1x28x8xf32, #tpu.memory_space<vmem>>, vector<1x28x8xf32>
    %1 = vector.shape_cast %0 : vector<1x28x8xf32> to vector<28x8xf32>
    %2 = vector.extract_strided_slice %1 {offsets = [0, 0], sizes = [10, 8], strides = [1, 1]} : vector<28x8xf32> to vector<10x8xf32>
    %c0_2 = arith.constant 0 : index
    %c0_3 = arith.constant 0 : index
    %3 = vector.load %arg2[%c0_2, %c0_3] : memref<40x128xf32, #tpu.memory_space<vmem>>, vector<8x128xf32>
    %c24 = arith.constant 24 : index
    %c0_4 = arith.constant 0 : index
    %4 = vector.load %arg2[%c24, %c0_4] : memref<40x128xf32, #tpu.memory_space<vmem>>, vector<1x128xf32>
    %cst = arith.constant dense<0.000000e+00> : vector<10x128xf32>
    %5 = tpu.matmul %2, %3, %cst {dimension_numbers = #tpu.dot_dimension_numbers<[1], [0], [0], [1], [0, 0, 1, 1], [], []>} : vector<10x8xf32>, vector<8x128xf32>, vector<10x128xf32> -> vector<10x128xf32>
    %6 = vector.broadcast %4 : vector<1x128xf32> to vector<10x128xf32>
    %7 = arith.addf %5, %6 : vector<10x128xf32>
    %cst_5 = arith.constant 0.000000e+00 : f32
    %8 = vector.broadcast %cst_5 : f32 to vector<10x128xf32>
    %9 = arith.maximumf %7, %8 : vector<10x128xf32>
    %10 = vector.extract_strided_slice %1 {offsets = [10, 0], sizes = [10, 8], strides = [1, 1]} : vector<28x8xf32> to vector<10x8xf32>
    %c8 = arith.constant 8 : index
    %c0_6 = arith.constant 0 : index
    %11 = vector.load %arg2[%c8, %c0_6] : memref<40x128xf32, #tpu.memory_space<vmem>>, vector<8x128xf32>
    %c25 = arith.constant 25 : index
    %c0_7 = arith.constant 0 : index
    %12 = vector.load %arg2[%c25, %c0_7] : memref<40x128xf32, #tpu.memory_space<vmem>>, vector<1x128xf32>
    %cst_8 = arith.constant dense<0.000000e+00> : vector<10x128xf32>
    %13 = tpu.matmul %10, %11, %cst_8 {dimension_numbers = #tpu.dot_dimension_numbers<[1], [0], [0], [1], [0, 0, 1, 1], [], []>} : vector<10x8xf32>, vector<8x128xf32>, vector<10x128xf32> -> vector<10x128xf32>
    %14 = vector.broadcast %12 : vector<1x128xf32> to vector<10x128xf32>
    %15 = arith.addf %13, %14 : vector<10x128xf32>
    %cst_9 = arith.constant 0.000000e+00 : f32
    %16 = vector.broadcast %cst_9 : f32 to vector<10x128xf32>
    %17 = arith.maximumf %15, %16 : vector<10x128xf32>
    %18 = vector.extract_strided_slice %1 {offsets = [20, 0], sizes = [6, 8], strides = [1, 1]} : vector<28x8xf32> to vector<6x8xf32>
    %c16 = arith.constant 16 : index
    %c0_10 = arith.constant 0 : index
    %19 = vector.load %arg2[%c16, %c0_10] : memref<40x128xf32, #tpu.memory_space<vmem>>, vector<8x128xf32>
    %c26 = arith.constant 26 : index
    %c0_11 = arith.constant 0 : index
    %20 = vector.load %arg2[%c26, %c0_11] : memref<40x128xf32, #tpu.memory_space<vmem>>, vector<1x128xf32>
    %cst_12 = arith.constant dense<0.000000e+00> : vector<6x128xf32>
    %21 = tpu.matmul %18, %19, %cst_12 {dimension_numbers = #tpu.dot_dimension_numbers<[1], [0], [0], [1], [0, 0, 1, 1], [], []>} : vector<6x8xf32>, vector<8x128xf32>, vector<6x128xf32> -> vector<6x128xf32>
    %22 = vector.broadcast %20 : vector<1x128xf32> to vector<6x128xf32>
    %23 = arith.addf %21, %22 : vector<6x128xf32>
    %cst_13 = arith.constant 0.000000e+00 : f32
    %24 = vector.broadcast %cst_13 : f32 to vector<6x128xf32>
    %25 = arith.maximumf %23, %24 : vector<6x128xf32>
    %26 = vector.extract_strided_slice %1 {offsets = [26, 0], sizes = [2, 8], strides = [1, 1]} : vector<28x8xf32> to vector<2x8xf32>
    %c27 = arith.constant 27 : index
    %c0_14 = arith.constant 0 : index
    %27 = vector.load %arg2[%c27, %c0_14] : memref<40x128xf32, #tpu.memory_space<vmem>>, vector<1x128xf32>
    %c30 = arith.constant 30 : index
    %c0_15 = arith.constant 0 : index
    %28 = vector.load %arg2[%c30, %c0_15] : memref<40x128xf32, #tpu.memory_space<vmem>>, vector<1x128xf32>
    %29 = vector.extract_strided_slice %26 {offsets = [0, 0], sizes = [2, 1], strides = [1, 1]} : vector<2x8xf32> to vector<2x1xf32>
    %30 = vector.broadcast %29 : vector<2x1xf32> to vector<2x128xf32>
    %31 = vector.broadcast %27 : vector<1x128xf32> to vector<2x128xf32>
    %32 = arith.mulf %30, %31 : vector<2x128xf32>
    %33 = vector.broadcast %28 : vector<1x128xf32> to vector<2x128xf32>
    %34 = arith.addf %32, %33 : vector<2x128xf32>
    %cst_16 = arith.constant 0.000000e+00 : f32
    %35 = vector.broadcast %cst_16 : f32 to vector<2x128xf32>
    %36 = arith.maximumf %34, %35 : vector<2x128xf32>
    %c28 = arith.constant 28 : index
    %c0_17 = arith.constant 0 : index
    %37 = vector.load %arg2[%c28, %c0_17] : memref<40x128xf32, #tpu.memory_space<vmem>>, vector<1x128xf32>
    %c31 = arith.constant 31 : index
    %c0_18 = arith.constant 0 : index
    %38 = vector.load %arg2[%c31, %c0_18] : memref<40x128xf32, #tpu.memory_space<vmem>>, vector<1x128xf32>
    %39 = vector.extract_strided_slice %26 {offsets = [0, 1], sizes = [2, 1], strides = [1, 1]} : vector<2x8xf32> to vector<2x1xf32>
    %40 = vector.broadcast %39 : vector<2x1xf32> to vector<2x128xf32>
    %41 = vector.broadcast %37 : vector<1x128xf32> to vector<2x128xf32>
    %42 = arith.mulf %40, %41 : vector<2x128xf32>
    %43 = vector.broadcast %38 : vector<1x128xf32> to vector<2x128xf32>
    %44 = arith.addf %42, %43 : vector<2x128xf32>
    %cst_19 = arith.constant 0.000000e+00 : f32
    %45 = vector.broadcast %cst_19 : f32 to vector<2x128xf32>
    %46 = arith.maximumf %44, %45 : vector<2x128xf32>
    %c29 = arith.constant 29 : index
    %c0_20 = arith.constant 0 : index
    %47 = vector.load %arg2[%c29, %c0_20] : memref<40x128xf32, #tpu.memory_space<vmem>>, vector<1x128xf32>
    %c32 = arith.constant 32 : index
    %c0_21 = arith.constant 0 : index
    %48 = vector.load %arg2[%c32, %c0_21] : memref<40x128xf32, #tpu.memory_space<vmem>>, vector<1x128xf32>
    %49 = vector.extract_strided_slice %26 {offsets = [0, 2], sizes = [2, 1], strides = [1, 1]} : vector<2x8xf32> to vector<2x1xf32>
    %50 = vector.broadcast %49 : vector<2x1xf32> to vector<2x128xf32>
    %51 = vector.broadcast %47 : vector<1x128xf32> to vector<2x128xf32>
    %52 = arith.mulf %50, %51 : vector<2x128xf32>
    %53 = vector.broadcast %48 : vector<1x128xf32> to vector<2x128xf32>
    %54 = arith.addf %52, %53 : vector<2x128xf32>
    %cst_22 = arith.constant 0.000000e+00 : f32
    %55 = vector.broadcast %cst_22 : f32 to vector<2x128xf32>
    %56 = arith.maximumf %54, %55 : vector<2x128xf32>
    %57 = vector.extract_strided_slice %9 {offsets = [0, 0], sizes = [2, 128], strides = [1, 1]} : vector<10x128xf32> to vector<2x128xf32>
    %58 = vector.extract_strided_slice %9 {offsets = [2, 0], sizes = [2, 128], strides = [1, 1]} : vector<10x128xf32> to vector<2x128xf32>
    %59 = vector.extract_strided_slice %9 {offsets = [4, 0], sizes = [2, 128], strides = [1, 1]} : vector<10x128xf32> to vector<2x128xf32>
    %60 = vector.extract_strided_slice %9 {offsets = [6, 0], sizes = [2, 128], strides = [1, 1]} : vector<10x128xf32> to vector<2x128xf32>
    %61 = vector.extract_strided_slice %9 {offsets = [8, 0], sizes = [2, 128], strides = [1, 1]} : vector<10x128xf32> to vector<2x128xf32>
    %62 = vector.extract_strided_slice %17 {offsets = [0, 0], sizes = [2, 128], strides = [1, 1]} : vector<10x128xf32> to vector<2x128xf32>
    %63 = vector.extract_strided_slice %17 {offsets = [2, 0], sizes = [2, 128], strides = [1, 1]} : vector<10x128xf32> to vector<2x128xf32>
    %64 = vector.extract_strided_slice %17 {offsets = [4, 0], sizes = [2, 128], strides = [1, 1]} : vector<10x128xf32> to vector<2x128xf32>
    %65 = vector.extract_strided_slice %17 {offsets = [6, 0], sizes = [2, 128], strides = [1, 1]} : vector<10x128xf32> to vector<2x128xf32>
    %66 = vector.extract_strided_slice %17 {offsets = [8, 0], sizes = [2, 128], strides = [1, 1]} : vector<10x128xf32> to vector<2x128xf32>
    %67 = vector.extract_strided_slice %25 {offsets = [0, 0], sizes = [2, 128], strides = [1, 1]} : vector<6x128xf32> to vector<2x128xf32>
    %68 = vector.extract_strided_slice %25 {offsets = [2, 0], sizes = [2, 128], strides = [1, 1]} : vector<6x128xf32> to vector<2x128xf32>
    %69 = vector.extract_strided_slice %25 {offsets = [4, 0], sizes = [2, 128], strides = [1, 1]} : vector<6x128xf32> to vector<2x128xf32>
    %70 = tpu.concatenate %57, %58, %59, %60, %61, %62, %63, %64, %65, %66, %67, %68, %69, %36, %46, %56 in 1 : vector<2x128xf32>, vector<2x128xf32>, vector<2x128xf32>, vector<2x128xf32>, vector<2x128xf32>, vector<2x128xf32>, vector<2x128xf32>, vector<2x128xf32>, vector<2x128xf32>, vector<2x128xf32>, vector<2x128xf32>, vector<2x128xf32>, vector<2x128xf32>, vector<2x128xf32>, vector<2x128xf32>, vector<2x128xf32> -> vector<2x2048xf32>
    %c33 = arith.constant 33 : index
    %c0_23 = arith.constant 0 : index
    %71 = vector.load %arg2[%c33, %c0_23] : memref<40x128xf32, #tpu.memory_space<vmem>>, vector<1x128xf32>
    %72 = arith.truncf %70 : vector<2x2048xf32> to vector<2x2048xbf16>
    %c0_24 = arith.constant 0 : index
    %c0_25 = arith.constant 0 : index
    %73 = vector.load %arg3[%c0_24, %c0_25] : memref<2048x128xbf16, #tpu.memory_space<vmem>>, vector<2048x128xbf16>
    %cst_26 = arith.constant dense<0.000000e+00> : vector<2x128xf32>
    %74 = tpu.matmul %72, %73, %cst_26 {dimension_numbers = #tpu.dot_dimension_numbers<[1], [0], [0], [1], [0, 0, 1, 1], [], []>} : vector<2x2048xbf16>, vector<2048x128xbf16>, vector<2x128xf32> -> vector<2x128xf32>
    %75 = vector.broadcast %71 : vector<1x128xf32> to vector<2x128xf32>
    %76 = arith.addf %74, %75 : vector<2x128xf32>
    %cst_27 = arith.constant 0.000000e+00 : f32
    %77 = vector.broadcast %cst_27 : f32 to vector<2x128xf32>
    %78 = arith.maximumf %76, %77 : vector<2x128xf32>
    %c34 = arith.constant 34 : index
    %c0_28 = arith.constant 0 : index
    %79 = vector.load %arg2[%c34, %c0_28] : memref<40x128xf32, #tpu.memory_space<vmem>>, vector<1x128xf32>
    %80 = arith.truncf %78 : vector<2x128xf32> to vector<2x128xbf16>
    %c0_29 = arith.constant 0 : index
    %c0_30 = arith.constant 0 : index
    %81 = vector.load %arg4[%c0_29, %c0_30] : memref<128x128xbf16, #tpu.memory_space<vmem>>, vector<128x128xbf16>
    %cst_31 = arith.constant dense<0.000000e+00> : vector<2x128xf32>
    %82 = tpu.matmul %80, %81, %cst_31 {dimension_numbers = #tpu.dot_dimension_numbers<[1], [0], [0], [1], [0, 0, 1, 1], [], []>} : vector<2x128xbf16>, vector<128x128xbf16>, vector<2x128xf32> -> vector<2x128xf32>
    %83 = vector.broadcast %79 : vector<1x128xf32> to vector<2x128xf32>
    %84 = arith.addf %82, %83 : vector<2x128xf32>
    %cst_32 = arith.constant dense<0xFF800000> : vector<2xf32>
    %85 = vector.multi_reduction <maximumf>, %84, %cst_32 [1] : vector<2x128xf32> to vector<2xf32>
    %86 = vector.shape_cast %85 : vector<2xf32> to vector<2x1xf32>
    %87 = vector.broadcast %86 : vector<2x1xf32> to vector<2x128xf32>
    %88 = arith.subf %84, %87 : vector<2x128xf32>
    %89 = math.exp %88 : vector<2x128xf32>
    %cst_33 = arith.constant dense<0.000000e+00> : vector<2xf32>
    %90 = vector.multi_reduction <add>, %89, %cst_33 [1] : vector<2x128xf32> to vector<2xf32>
    %91 = vector.shape_cast %90 : vector<2xf32> to vector<2x1xf32>
    %92 = vector.broadcast %91 : vector<2x1xf32> to vector<2x128xf32>
    %93 = arith.divf %89, %92 : vector<2x128xf32>
    %c0_34 = arith.constant 0 : index
    %c0_35 = arith.constant 0 : index
    %c0_36 = arith.constant 0 : index
    %94 = vector.load %arg5[%c0_34, %c0_35, %c0_36] : memref<1x2x128xf32, #tpu.memory_space<vmem>>, vector<1x2x128xf32>
    %95 = vector.shape_cast %94 : vector<1x2x128xf32> to vector<2x128xf32>
    %96 = vector.shape_cast %93 : vector<2x128xf32> to vector<1x2x128xf32>
    tpu.vector_store %arg5[%c0_34, %c0_35, %c0_36], %96 {strides = array<i32>} : memref<1x2x128xf32, #tpu.memory_space<vmem>>, vector<1x2x128xf32>,
    return
  }
  func.func @transform_0(%arg0: i32) -> (i32, i32, i32) {
    %c0_i32 = arith.constant 0 : i32
    %c0_i32_0 = arith.constant 0 : i32
    %c0_i32_1 = arith.constant 0 : i32
    return %arg0, %c0_i32, %c0_i32_0 : i32, i32, i32
  }
  func.func @transform_1(%arg0: i32) -> (i32, i32) {
    %c0_i32 = arith.constant 0 : i32
    %c0_i32_0 = arith.constant 0 : i32
    %c0_i32_1 = arith.constant 0 : i32
    return %c0_i32, %c0_i32_0 : i32, i32
  }
  func.func @transform_2(%arg0: i32) -> (i32, i32) {
    %c0_i32 = arith.constant 0 : i32
    %c0_i32_0 = arith.constant 0 : i32
    %c0_i32_1 = arith.constant 0 : i32
    return %c0_i32, %c0_i32_0 : i32, i32
  }
  func.func @transform_3(%arg0: i32) -> (i32, i32) {
    %c0_i32 = arith.constant 0 : i32
    %c0_i32_0 = arith.constant 0 : i32
    %c0_i32_1 = arith.constant 0 : i32
    return %c0_i32, %c0_i32_0 : i32, i32
  }
  func.func @transform_4(%arg0: i32) -> (i32, i32, i32) {
    %c0_i32 = arith.constant 0 : i32
    %c0_i32_0 = arith.constant 0 : i32
    %c0_i32_1 = arith.constant 0 : i32
    return %arg0, %c0_i32, %c0_i32_0 : i32, i32, i32
  }
}

</mosaic_0001>

<bundles_post_ra>
// kernel: actor_forward.1
= control target key start
LH: loop header
LB: loop body
LE: loop exit
PB: predicated region body
PF: predicated region fallthrough
CT: control target
= control target key end

     0   :  { %s2673_s15 = smov 0   ;;  %s3189_s0 = inlined_call_operand.vmem [shape: f32[8,28,8], index: 0, kind: input, shape index: {}]   ;;  %s3190_s1 = inlined_call_operand.vmem [shape: f32[40,128], index: 1, kind: input, shape index: {}]   ;;  %s3191_s2 = inlined_call_operand.vmem [shape: bf16[2048,128], index: 2, kind: input, shape index: {}]   ;;  %s3192_s3 = inlined_call_operand.vmem [shape: bf16[128,128], index: 3, kind: input, shape index: {}]   ;;  %s3193_s4 = inlined_call_operand.vmem [shape: f32[8,2,128], index: 4, kind: output, shape index: {}]  }
   0x1 LB: > { %s2088_s16 = sadd.s32 4294967295, %s2641_s15   ;;  %p2092_p0 = scmp.ge.s32.totalorder %s2641_s15, 1  ;;  %s2641_s15 = sphi %s2673_s15, %s14_s15  }
   0x2   : > { %p162_p1 = scmp.lt.s32.totalorder %s2641_s15, 9 }
   0x4   : > { %p163_p2 = pnand %p2092_p0, %p162_p1 }
   0x5   : > { %v201_v0 = vld [vmem:[%s3190_s1] sm:$0xff] (!%p163_p2)  ;;  %p187_p3 = scmp.lt.s32.totalorder (!%p163_p2), %s2088_s16, 7  ;;  %v291_v1 = vld [vmem:[%s3190_s1 + $0x8] sm:$0xff] (!%p163_p2)  ;;  %v2643_v3 = vmov (!%p163_p2), 0   ;;  %v2644_v4 = vmov (!%p163_p2), 1   ;;  %vm207_vm0 = vcmask (!%p163_p2), 64512  }
   0x6   : > { %166 = sbr.rel (%p163_p2) target bundleno = 1088 (0x440), region = 36  ;;  %2444 = vmatprep.subr.mxu0 (!%p163_p2), %v201_v0  ;;  %v2495_v2 = vld [vmem:[%s3191_s2 + $0x40] sm:$0xff] (!%p163_p2)   ;;  %2492 = vset.pattern.permute.xlu0 (!%p163_p2), %v2643_v3  ;;  %vm298_vm1 = vcmask (!%p163_p2), 1045504   ;;  %v2499_v12 = vld [vmem:[%s3191_s2 + $0x48] sm:$0xff] (!%p163_p2)   ;;  %v383_v14 = vld [vmem:[%s3190_s1 + $0x10] sm:$0xff] (!%p163_p2)  ;;  %v2645_v18 = vmov (!%p163_p2), 0.0  }
   0x7   : > { %2445 = vmatpush3.msra.mxu0 (!%p163_p2), %v201_v0  ;;  %2494 = vset.pattern.permute.xlu1 (!%p163_p2), %v2644_v4  ;;  %v2497_v5 = vld [vmem:[%s3191_s2] sm:$0xff] (!%p163_p2)   ;;  %vm390_vm2 = vcmask (!%p163_p2), 1043456   ;;  %v2501_v19 = vld [vmem:[%s3191_s2 + $0x8] sm:$0xff] (!%p163_p2)   ;;  %v2646_v20 = vmov (!%p163_p2), 2   ;;  %v2503_v22 = vld [vmem:[%s3191_s2 + $0x50] sm:$0xff] (!%p163_p2)   ;;  %vm2647_vm3 = vmmov (!%p163_p2), 0  }
   0x8   : > { %2449 = vmatprep.subr.mxu0 (!%p163_p2), %v291_v1  ;;  %2259 = vmatprep.subr.bf16.mxu1 (!%p163_p2), %v2495_v2  ;;  %v2496_v16 = vld [vmem:[%s3191_s2 + $0xc0] sm:$0xff] (!%p163_p2)   ;;  %v2500_v24 = vld [vmem:[%s3191_s2 + $0xc8] sm:$0xff] (!%p163_p2)   ;;  %v2505_v25 = vld [vmem:[%s3191_s2 + $0x10] sm:$0xff] (!%p163_p2)   ;;  %vm2022_vm4 = vcmask (!%p163_p2), 1041408  }
   0x9   : > { %2260 = vmatpush3.bf16.msra.mxu1 (!%p163_p2), %v2497_v5  ;;  %v2498_v21 = vld [vmem:[%s3191_s2 + $0x80] sm:$0xff] (!%p163_p2)   ;;  %v2502_v26 = vld [vmem:[%s3191_s2 + $0x88] sm:$0xff] (!%p163_p2)   ;;  %v2507_v27 = vld [vmem:[%s3191_s2 + $0x58] sm:$0xff] (!%p163_p2)  }
   0xa   : > { %2261 = vmatprep.subr.bf16.mxu1 (!%p163_p2), %v2499_v12  ;;  %v2504_v28 = vld [vmem:[%s3191_s2 + $0xd0] sm:$0xff] (!%p163_p2)   ;;  %v2509_v29 = vld [vmem:[%s3191_s2 + $0x18] sm:$0xff] (!%p163_p2)   ;;  %v2511_v31 = vld [vmem:[%s3191_s2 + $0x60] sm:$0xff] (!%p163_p2)  }
   0xb   : > { %v2506_v30 = vld [vmem:[%s3191_s2 + $0x90] sm:$0xff] (!%p163_p2)   ;;  %v2508_v32 = vld [vmem:[%s3191_s2 + $0xd8] sm:$0xff] (!%p163_p2)   ;;  %v2513_v33 = vld [vmem:[%s3191_s2 + $0x20] sm:$0xff] (!%p163_p2)  }
   0xc   : > { %v2510_v34 = vld [vmem:[%s3191_s2 + $0x98] sm:$0xff] (!%p163_p2)   ;;  %v2515_v35 = vld [vmem:[%s3191_s2 + $0x68] sm:$0xff] (!%p163_p2)   ;;  %v2512_v36 = vld [vmem:[%s3191_s2 + $0xe0] sm:$0xff] (!%p163_p2)  }
   0xd   : > { %s3195_s16 = smov (!%p187_p3, %s2088_s16), 7  ;;  %2262 = vmatpush3.bf16.msra.mxu1 %v2501_v19  ;;  %v2517_v37 = vld [vmem:[%s3191_s2 + $0x28] sm:$0xff]   ;;  %v2514_v38 = vld [vmem:[%s3191_s2 + $0xa0] sm:$0xff]   ;;  %v2519_v41 = vld [vmem:[%s3191_s2 + $0x70] sm:$0xff]  }
   0xe   : > { %s2250_s23 = sshll.u32 %s3195_s16, 5  ;;  %2263 = vmatprep.subr.bf16.mxu1 %v2503_v22  ;;  %v2516_v39 = vld [vmem:[%s3191_s2 + $0xe8] sm:$0xff]   ;;  %v2520_v42 = vld [vmem:[%s3191_s2 + $0xf0] sm:$0xff]   ;;  %v2523_v45 = vld [vmem:[%s3191_s2 + $0x78] sm:$0xff]   ;;  %s2095_s7 = sshll.u32 %s3195_s16, 1 }
   0xf   : > { %s191_s26 = scalar_lea.vmem %s3189_s0, %s2250_s23  ;;  %v2518_v40 = vld [vmem:[%s3191_s2 + $0xa8] sm:$0xff]   ;;  %v2521_v43 = vld [vmem:[%s3191_s2 + $0x30] sm:$0xff]   ;;  %v2524_v46 = vld [vmem:[%s3191_s2 + $0xf8] sm:$0xff]   ;;  %s195_s10 = scalar_lea.vmem %s3193_s4, %s2095_s7 }
  0x10   : > { %v197_v6 = vld [vmem:[%s191_s26] sm:$0xff]  ;;  %v199_v7 = vld [vmem:[%s191_s26 + $0x10] sm:$0xff]  ;;  %v200_v8 = vld [vmem:[%s191_s26 + $0x18] sm:$0xf] }
  0x11   : > { %2446 = vmatprep.mubr.msk.f32.mxu0 %vm207_vm0, %v197_v6  ;;  %v391_v9 = vrot.slane %v199_v7, 4  ;;  %v198_v10 = vld [vmem:[%s191_s26 + $0x8] sm:$0xff]  ;;  %v300_v11 = vrot.slane %v199_v7, 2  ;;  %470 = vperm.xlu0 %2492, %v200_v8   ;;  %v392_v15 = vrot.slane %v200_v8, 4  ;;  %v2522_v44 = vld [vmem:[%s3191_s2 + $0xb0] sm:$0xff]   ;;  %v2525_v47 = vld [vmem:[%s3191_s2 + $0x38] sm:$0xff]  }
  0x12   : > { %2447 = vmatmul.mubr.msk.f32.vlgmr.msra.gmra.mrb[0].mxu0 %vm207_vm0, %v198_v10  ;;  %v299_v13 = vrot.slane %v198_v10, 2  ;;  %487 = vperm.xlu1 %2494, %v200_v8   ;;  %v2526_v48 = vld [vmem:[%s3191_s2 + $0xb8] sm:$0xff]   ;;  %v2527_v49 = vld [vmem:[%s3191_s2 + $0x140] sm:$0xff]   ;;  %v2531_v6 = vld [vmem:[%s3191_s2 + $0x148] sm:$0xff]  }
  0x13   : > { %2450 = vmatpush3.msra.mxu0 %v291_v1  ;;  %v393_v23 = vsel %vm390_vm2, %v391_v9, %v392_v15  ;;  %2264 = vmatpush3.bf16.msra.mxu1 %v2505_v25  ;;  %v2528_v50 = vld [vmem:[%s3191_s2 + $0x1c0] sm:$0xff]   ;;  %v2809_v51 = vld [vmem:[%s3190_s1 + $0x18] ss:$0 sm:$0xff]  ;;  %v2819_v57 = vld [vmem:[%s3190_s1 + $0x19] ss:$0 sm:$0xff] }
  0x14   : > { %v301_v17 = vsel %vm298_vm1, %v299_v13, %v300_v11  ;;  %2454 = vmatprep.subr.mxu0 %v2645_v18  ;;  %2265 = vmatprep.subr.bf16.mxu1 %v2507_v27  ;;  %v2529_v2 = vld [vmem:[%s3191_s2 + $0x100] sm:$0xff]   ;;  %v2532_v7 = vld [vmem:[%s3191_s2 + $0x1c8] sm:$0xff]   ;;  %v2536_v15 = vld [vmem:[%s3191_s2 + $0x1d0] sm:$0xff]  }
  0x15   : > { %2451 = vmatprep.mubr.msk.f32.mxu0 %vm207_vm0, %v301_v17  ;;  %2493 = vset.pattern.permute.xlu0 %v2646_v20  ;;  %v2530_v3 = vld [vmem:[%s3191_s2 + $0x180] sm:$0xff]   ;;  %v2533_v12 = vld [vmem:[%s3191_s2 + $0x108] sm:$0xff]   ;;  %v2537_v17 = vld [vmem:[%s3191_s2 + $0x110] sm:$0xff]  }
  0x16   : > { %2452 = vmatmul.mubr.msk.f32.vlgmr.msra.gmra.mrb[2].mxu0 %vm207_vm0, %v300_v11  ;;  %504 = vperm.xlu0 %2493, %v200_v8   ;;  %v2534_v13 = vld [vmem:[%s3191_s2 + $0x188] sm:$0xff]   ;;  %v2538_v19 = vld [vmem:[%s3191_s2 + $0x190] sm:$0xff]   ;;  %v2539_v20 = vld [vmem:[%s3191_s2 + $0x158] sm:$0xff]  }
  0x17   : > { %2455 = vmatpush3.msra.mxu0 %v383_v14  ;;  %2456 = vmatprep.mubr.msk.f32.mxu0 %vm2647_vm3, %v2645_v18  ;;  %v2535_v14 = vld [vmem:[%s3191_s2 + $0x150] sm:$0xff]   ;;  %v2541_v22 = vld [vmem:[%s3191_s2 + $0x118] sm:$0xff]   ;;  %v2544_v25 = vld [vmem:[%s3191_s2 + $0x1e0] sm:$0xff]  }
  0x18   : > { %2281 = vmatprep.subr.bf16.mxu0 %v2496_v16  ;;  %2266 = vmatpush3.bf16.msra.mxu1 %v2509_v29  ;;  %v2546_v27 = vld [vmem:[%s3191_s2 + $0x1a0] sm:$0xff]   ;;  %v2548_v29 = vld [vmem:[%s3191_s2 + $0x1e8] sm:$0xff]  }
  0x19   : > { %2267 = vmatprep.subr.bf16.mxu1 %v2511_v31  ;;  %v2549_v31 = vld [vmem:[%s3191_s2 + $0x128] sm:$0xff]  }
  0x1a   : > { %2457 = vmatmul.mubr.msk.f32.vlgmr.msra.gmra.mrb[4].mxu0 %vm207_vm0, %v393_v23  ;;  %v2542_v23 = vld [vmem:[%s3191_s2 + $0x198] sm:$0xff]  }
  0x1b   : > { %2282 = vmatpush3.bf16.msra.mxu0 %v2498_v21  ;;  %v2540_v21 = vld [vmem:[%s3191_s2 + $0x1d8] sm:$0xff]  }
  0x1c   : > { %2283 = vmatprep.subr.bf16.mxu0 %v2500_v24  ;;  %2268 = vmatpush3.bf16.msra.mxu1 %v2513_v33  ;;  %v2543_v24 = vld [vmem:[%s3191_s2 + $0x160] sm:$0xff]   ;;  %v2551_v33 = vld [vmem:[%s3191_s2 + $0x170] sm:$0xff]  }
  0x1d   : > { %2269 = vmatprep.subr.bf16.mxu1 %v2515_v35 }
  0x1f   : > { %2284 = vmatpush3.bf16.msra.mxu0 %v2502_v26  ;;  %v2545_v26 = vld [vmem:[%s3191_s2 + $0x120] sm:$0xff]  }
  0x20   : > { %2285 = vmatprep.subr.bf16.mxu0 %v2504_v28  ;;  %2270 = vmatpush3.bf16.msra.mxu1 %v2517_v37  ;;  %v2547_v28 = vld [vmem:[%s3191_s2 + $0x168] sm:$0xff]   ;;  %v2554_v37 = vld [vmem:[%s3191_s2 + $0x1b0] sm:$0xff]  }
  0x21   : > { %2271 = vmatprep.subr.bf16.mxu1 %v2519_v41 }
  0x23   : > { %2286 = vmatpush3.bf16.msra.mxu0 %v2506_v30  ;;  %v2102_v30 = vld [vmem:[%s3190_s1 + $0x1a] ss:$0 sm:$0xff] }
  0x24   : > { %2287 = vmatprep.subr.bf16.mxu0 %v2508_v32  ;;  %2272 = vmatpush3.bf16.msra.mxu1 %v2521_v43  ;;  %v2550_v32 = vld [vmem:[%s3191_s2 + $0x1a8] sm:$0xff]  }
  0x25   : > { %2273 = vmatprep.subr.bf16.mxu1 %v2523_v45  ;;  %v2558_v45 = vld [vmem:[%s3191_s2 + $0x1b8] sm:$0xff]  }
  0x27   : > { %2288 = vmatpush3.bf16.msra.mxu0 %v2510_v34  ;;  %v2552_v34 = vld [vmem:[%s3191_s2 + $0x1f0] sm:$0xff]  }
  0x28   : > { %2289 = vmatprep.subr.bf16.mxu0 %v2512_v36  ;;  %2274 = vmatpush3.bf16.msra.mxu1 %v2525_v47  ;;  %v2553_v36 = vld [vmem:[%s3191_s2 + $0x130] sm:$0xff]   ;;  %v2559_v47 = vld [vmem:[%s3191_s2 + $0x240] sm:$0xff]  }
  0x29   : > { %2303 = vmatprep.subr.bf16.mxu1 %v2527_v49 }
  0x2b   : > { %2290 = vmatpush3.bf16.msra.mxu0 %v2514_v38 }
  0x2c   : > { %2291 = vmatprep.subr.bf16.mxu0 %v2516_v39  ;;  %v2555_v39 = vld [vmem:[%s3191_s2 + $0x178] sm:$0xff]  }
  0x2f   : > { %2292 = vmatpush3.bf16.msra.mxu0 %v2518_v40  ;;  %v2556_v40 = vld [vmem:[%s3191_s2 + $0x1f8] sm:$0xff]  }
  0x30   : > { %2293 = vmatprep.subr.bf16.mxu0 %v2520_v42 }
  0x33   : > { %2294 = vmatpush3.bf16.msra.mxu0 %v2522_v44  ;;  %v2557_v44 = vld [vmem:[%s3191_s2 + $0x138] sm:$0xff]  }
  0x34   : > { %2295 = vmatprep.subr.bf16.mxu0 %v2524_v46 }
  0x37   : > { %2296 = vmatpush3.bf16.msra.mxu0 %v2526_v48  ;;  %v2560_v48 = vld [vmem:[%s3191_s2 + $0x2c0] sm:$0xff]  }
  0x38   : > { %2325 = vmatprep.subr.bf16.mxu0 %v2528_v50 }
  0xe5   : > { %v2811_v52 = vpop.f32.mrb[0].mxu0 }
  0xe6   : > { %v280_v53 = vpop.f32.mrb[1].mxu0  ;;  %v286_v38 = vadd.f32 %v2811_v52, %v2809_v51  ;;  %v2561_v52 = vld [vmem:[%s3191_s2 + $0x200] sm:$0xff]  }
  0xe7   : > { %v281_v54 = vadd.f32 %v2809_v51, %v280_v53 }
  0xe8   : > { %v290_v46 = vmax.f32 %v286_v38, 0.0 }
  0xe9   : > { %v289_v55 = vmax.f32 %v281_v54, 0.0  ;;  %v2814_v56 = vpop.f32.mrb[2].mxu0  ;;  %v2562_v54 = vld [vmem:[%s3191_s2 + $0x280] sm:$0xff]  }
  0xea   : > { %v372_v58 = vpop.f32.mrb[3].mxu0  ;;  %v378_v41 = vadd.f32 %v2814_v56, %v2819_v57  ;;  %v551_v53 = vpack.c.bf16 %v290_v46, %v290_v46 }
  0xeb   : > { %v519_v59 = vrot.slane %v289_v55, 2  ;;  %v523_v60 = vrot.slane %v289_v55, 6  ;;  %v521_v61 = vrot.slane %v289_v55, 4  ;;  %v373_v62 = vadd.f32 %v2819_v57, %v372_v58  ;;  %v2564_v57 = vld [vmem:[%s3191_s2 + $0x2c8] sm:$0xff]  }
  0xec   : > { %v547_v5 = vpack.c.bf16 %v289_v55, %v289_v55  ;;  %v382_v49 = vmax.f32 %v378_v41, 0.0  ;;  %v2563_v55 = vld [vmem:[%s3191_s2 + $0x248] sm:$0xff]   ;;  %v2593_v41 = vld [vmem:[%s3191_s2 + $0x300] sm:$0xff]  }
  0xed   : > { %v548_v63 = vpack.c.bf16 %v519_v59, %v519_v59  ;;  %v550_v0 = vpack.c.bf16 %v523_v60, %v523_v60  ;;  %v549_v1 = vpack.c.bf16 %v521_v61, %v521_v61  ;;  %v462_v4 = vpop.f32.mrb[4].mxu0  ;;  %v2834_v8 = vmax.f32 %v373_v62, 0.0  ;;  %v2565_v59 = vld [vmem:[%s3191_s2 + $0x208] sm:$0xff]   ;;  %v2567_v61 = vld [vmem:[%s3191_s2 + $0x250] sm:$0xff]  }
  0xee   : > { %v2458_v9 = vpop.f32.mrb[5].mxu0  ;;  %v463_v35 = vadd.f32 %v2102_v30, %v462_v4  ;;  %v556_v56 = vpack.c.bf16 %v382_v49, %v382_v49  ;;  %v2566_v60 = vld [vmem:[%s3191_s2 + $0x288] sm:$0xff]   ;;  %v2568_v62 = vld [vmem:[%s3191_s2 + $0x2d0] sm:$0xff]   ;;  %v2573_v4 = vld [vmem:[%s3191_s2 + $0x218] sm:$0xff]  }
  0xef   : > { %1623 = vmatprep.mubr.bf16.mxu1 %v548_v63  ;;  %1663 = vmatprep.mubr.bf16.mxu0 %v550_v0  ;;  %v552_v10 = vpack.c.bf16 %v2834_v8, %v2834_v8  ;;  %v528_v11 = vrot.slane %v2834_v8, 4  ;;  %v526_v43 = vrot.slane %v2834_v8, 2  ;;  %v2569_v63 = vld [vmem:[%s3191_s2 + $0x210] sm:$0xff]   ;;  %v2104_v9 = vld [vmem:[%s3190_s1 + $0x1b] ss:$0 sm:$0xff]  ;;  %v2598_v49 = vld [vmem:[%s3191_s2 + $0x388] sm:$0xff]  }
  0xf0   : > { %1624 = vmatmul.mubr.bf16.vlgmr.msra.gmra.mrb[0].mxu1 %v547_v5  ;;  %1664 = vmatmul.mubr.bf16.vlgmr.msra.gmra.mrb[8].mxu0 %v549_v1  ;;  %v2918_v42 = vmax.f32 %v463_v35, 0.0  ;;  %v2570_v0 = vld [vmem:[%s3191_s2 + $0x290] sm:$0xff]   ;;  %v2571_v1 = vld [vmem:[%s3191_s2 + $0x258] sm:$0xff]   ;;  %v530_v35 = vrot.slane %v2834_v8, 6 }
  0xf1   : > { %2304 = vmatpush3.bf16.msra.mxu1 %v2529_v2  ;;  %2326 = vmatpush3.bf16.msra.mxu0 %v2530_v3  ;;  %v554_v16 = vpack.c.bf16 %v528_v11, %v528_v11  ;;  %v553_v51 = vpack.c.bf16 %v526_v43, %v526_v43  ;;  %v2572_v2 = vld [vmem:[%s3191_s2 + $0x2d8] sm:$0xff]   ;;  %v471_v3 = vpop.permute.xlu0 %470  ;;  %v2594_v43 = vld [vmem:[%s3191_s2 + $0x380] sm:$0xff]  }
  0xf2   : > { %2305 = vmatprep.subr.bf16.mxu1 %v2531_v6  ;;  %2327 = vmatprep.subr.bf16.mxu0 %v2532_v7  ;;  %v533_v50 = vrot.slane %v2918_v42, 2  ;;  %v2574_v5 = vld [vmem:[%s3191_s2 + $0x298] sm:$0xff]   ;;  %v2575_v6 = vld [vmem:[%s3191_s2 + $0x260] sm:$0xff]   ;;  %v555_v8 = vpack.c.bf16 %v530_v35, %v530_v35 }
  0xf3   : > { %1703 = vmatprep.mubr.bf16.mxu1 %v552_v10  ;;  %1743 = vmatprep.mubr.bf16.mxu0 %v554_v16  ;;  %v2576_v7 = vld [vmem:[%s3191_s2 + $0x2e0] sm:$0xff]   ;;  %v2108_v11 = vld [vmem:[%s3190_s1 + $0x1d] ss:$0 sm:$0xff]  ;;  %v477_v16 = vmul.f32 %v2104_v9, %v471_v3  ;;  %v2612_v3 = vld [vmem:[%s3191_s2 + $0x3e8] sm:$0xff]  }
  0xf4   : > { %v558_v58 = vpack.c.bf16 %v533_v50, %v533_v50  ;;  %v2577_v10 = vld [vmem:[%s3191_s2 + $0x220] sm:$0xff]   ;;  %v2588_v30 = vld [vmem:[%s3191_s2 + $0x2f8] sm:$0xff]   ;;  %v2599_v50 = vld [vmem:[%s3191_s2 + $0x350] sm:$0xff]  }
  0xf5   : > { %2306 = vmatpush3.bf16.msra.mxu1 %v2533_v12  ;;  %2328 = vmatpush3.bf16.msra.mxu0 %v2534_v13  ;;  %v505_v12 = vpop.permute.xlu0 %504  ;;  %v2578_v13 = vld [vmem:[%s3191_s2 + $0x2a0] sm:$0xff]   ;;  %v2616_v9 = vld [vmem:[%s3191_s2 + $0x3f0] sm:$0xff]  }
  0xf6   : > { %2307 = vmatprep.subr.bf16.mxu1 %v2535_v14  ;;  %2329 = vmatprep.subr.bf16.mxu0 %v2536_v15  ;;  %v2579_v14 = vld [vmem:[%s3191_s2 + $0x268] sm:$0xff]  }
  0xf7   : > { %v2580_v15 = vld [vmem:[%s3191_s2 + $0x2e8] sm:$0xff]  }
  0xf9   : > { %2308 = vmatpush3.bf16.msra.mxu1 %v2537_v17  ;;  %2330 = vmatpush3.bf16.msra.mxu0 %v2538_v19  ;;  %v2105_v17 = vld [vmem:[%s3190_s1 + $0x1e] ss:$0 sm:$0xff]  ;;  %v511_v19 = vmul.f32 %v2108_v11, %v505_v12  ;;  %v2617_v11 = vld [vmem:[%s3191_s2 + $0x330] sm:$0xff]  }
  0xfa   : > { %2309 = vmatprep.subr.bf16.mxu1 %v2539_v20  ;;  %2331 = vmatprep.subr.bf16.mxu0 %v2540_v21  ;;  %v2581_v20 = vld [vmem:[%s3191_s2 + $0x228] sm:$0xff]   ;;  %v2109_v21 = vld [vmem:[%s3190_s1 + $0x20] ss:$0 sm:$0xff]  ;;  %v2618_v12 = vld [vmem:[%s3191_s2 + $0x3b0] sm:$0xff]  }
  0xfd   : > { %2310 = vmatpush3.bf16.msra.mxu1 %v2541_v22  ;;  %2332 = vmatpush3.bf16.msra.mxu0 %v2542_v23  ;;  %v2582_v22 = vld [vmem:[%s3191_s2 + $0x2a8] sm:$0xff]   ;;  %v2583_v23 = vld [vmem:[%s3191_s2 + $0x270] sm:$0xff]  }
  0xfe   : > { %2311 = vmatprep.subr.bf16.mxu1 %v2543_v24  ;;  %2333 = vmatprep.subr.bf16.mxu0 %v2544_v25  ;;  %v2584_v24 = vld [vmem:[%s3191_s2 + $0x2f0] sm:$0xff]   ;;  %v482_v25 = vadd.f32 %v2105_v17, %v477_v16  ;;  %v2621_v16 = vld [vmem:[%s3191_s2 + $0x338] sm:$0xff]   ;;  %v535_v17 = vrot.slane %v2918_v42, 4 }
 0x101   : > { %2312 = vmatpush3.bf16.msra.mxu1 %v2545_v26  ;;  %2334 = vmatpush3.bf16.msra.mxu0 %v2546_v27  ;;  %v516_v26 = vadd.f32 %v2109_v21, %v511_v19  ;;  %v2585_v27 = vld [vmem:[%s3191_s2 + $0x230] sm:$0xff]   ;;  %v2622_v19 = vld [vmem:[%s3191_s2 + $0x3b8] sm:$0xff]   ;;  %v559_v21 = vpack.c.bf16 %v535_v17, %v535_v17 }
 0x102   : > { %2313 = vmatprep.subr.bf16.mxu1 %v2547_v28  ;;  %2335 = vmatprep.subr.bf16.mxu0 %v2548_v29  ;;  %v2586_v28 = vld [vmem:[%s3191_s2 + $0x2b0] sm:$0xff]   ;;  %v2587_v29 = vld [vmem:[%s3191_s2 + $0x278] sm:$0xff]  }
 0x105   : > { %2314 = vmatpush3.bf16.msra.mxu1 %v2549_v31  ;;  %2336 = vmatpush3.bf16.msra.mxu0 %v2550_v32  ;;  %v483_v31 = vmax.f32 %v482_v25, 0.0  ;;  %v517_v32 = vmax.f32 %v516_v26, 0.0  ;;  %v2627_v25 = vld [vmem:[%s3192_s3 + $0x20] sm:$0xff]   ;;  %v2628_v26 = vld [vmem:[%s3192_s3 + $0x28] sm:$0xff]  }
 0x106   : > { %2315 = vmatprep.subr.bf16.mxu1 %v2551_v33  ;;  %2337 = vmatprep.subr.bf16.mxu0 %v2552_v34  ;;  %v2589_v33 = vld [vmem:[%s3191_s2 + $0x238] sm:$0xff]  }
 0x107   : > { %v2590_v34 = vld [vmem:[%s3191_s2 + $0x2b8] sm:$0xff]   ;;  %v538_v38 = vrot.slane %v483_v31, 2  ;;  %v2110_v31 = vld [vmem:[%s3190_s1 + $0x21] ss:$0 sm:$0xff] }
 0x109   : > { %2316 = vmatpush3.bf16.msra.mxu1 %v2553_v36  ;;  %2338 = vmatpush3.bf16.msra.mxu0 %v2554_v37  ;;  %v2591_v36 = vld [vmem:[%s3191_s2 + $0x340] sm:$0xff]   ;;  %v560_v46 = vpack.c.bf16 %v538_v38, %v538_v38 }
 0x10a   : > { %2317 = vmatprep.subr.bf16.mxu1 %v2555_v39  ;;  %2339 = vmatprep.subr.bf16.mxu0 %v2556_v40  ;;  %v2592_v37 = vld [vmem:[%s3191_s2 + $0x3c0] sm:$0xff]   ;;  %v544_v39 = vrot.slane %v517_v32, 2  ;;  %v557_v40 = vpack.c.bf16 %v2918_v42, %v2918_v42 }
 0x10b   : > { %v2623_v42 = vld [vmem:[%s3192_s3] sm:$0xff]  }
 0x10d   : > { %2318 = vmatpush3.bf16.msra.mxu1 %v2557_v44  ;;  %2340 = vmatpush3.bf16.msra.mxu0 %v2558_v45  ;;  %v2595_v44 = vld [vmem:[%s3191_s2 + $0x348] sm:$0xff]  }
 0x10e   : > { %2347 = vmatprep.subr.bf16.mxu1 %v2559_v47  ;;  %2369 = vmatprep.subr.bf16.mxu0 %v2560_v48  ;;  %v2596_v45 = vld [vmem:[%s3191_s2 + $0x3c8] sm:$0xff]   ;;  %v562_v47 = vpack.c.bf16 %v544_v39, %v544_v39 }
 0x10f   : > { %v2597_v48 = vld [vmem:[%s3191_s2 + $0x308] sm:$0xff]  }
 0x110   : > { %1704 = vmatmul.mubr.bf16.vlgmr.msra.gmra.mrb[4].mxu1 %v551_v53  ;;  %1744 = vmatmul.mubr.bf16.vlgmr.msra.gmra.mrb[12].mxu0 %v553_v51  ;;  %v2600_v51 = vld [vmem:[%s3191_s2 + $0x3d0] sm:$0xff]  }
 0x111   : > { %2348 = vmatpush3.bf16.msra.mxu1 %v2561_v52  ;;  %1783 = vmatprep.mubr.bf16.mxu1 %v556_v56  ;;  %v2601_v52 = vld [vmem:[%s3191_s2 + $0x310] sm:$0xff]   ;;  %v2605_v56 = vld [vmem:[%s3191_s2 + $0x318] sm:$0xff]  }
 0x112   : > { %2370 = vmatpush3.bf16.msra.mxu0 %v2562_v54  ;;  %2349 = vmatprep.subr.bf16.mxu1 %v2563_v55  ;;  %v2602_v53 = vld [vmem:[%s3191_s2 + $0x390] sm:$0xff]   ;;  %v2603_v54 = vld [vmem:[%s3191_s2 + $0x358] sm:$0xff]  }
 0x113   : > { %2371 = vmatprep.subr.bf16.mxu0 %v2564_v57  ;;  %1823 = vmatprep.mubr.bf16.mxu0 %v558_v58  ;;  %v2604_v55 = vld [vmem:[%s3191_s2 + $0x3d8] sm:$0xff]   ;;  %v2607_v58 = vld [vmem:[%s3191_s2 + $0x360] sm:$0xff]  }
 0x114   : > { %v2606_v57 = vld [vmem:[%s3191_s2 + $0x398] sm:$0xff]  }
 0x115   : > { %2350 = vmatpush3.bf16.msra.mxu1 %v2565_v59  ;;  %v2106_v59 = vld [vmem:[%s3190_s1 + $0x1c] ss:$0 sm:$0xff] }
 0x116   : > { %2372 = vmatpush3.bf16.msra.mxu0 %v2566_v60  ;;  %2351 = vmatprep.subr.bf16.mxu1 %v2567_v61  ;;  %v488_v60 = vpop.permute.xlu1 %487  ;;  %v2608_v61 = vld [vmem:[%s3191_s2 + $0x3e0] sm:$0xff]  }
 0x117   : > { %2373 = vmatprep.subr.bf16.mxu0 %v2568_v62  ;;  %v2609_v62 = vld [vmem:[%s3191_s2 + $0x320] sm:$0xff]  }
 0x119   : > { %2352 = vmatpush3.bf16.msra.mxu1 %v2569_v63  ;;  %v494_v63 = vmul.f32 %v2106_v59, %v488_v60 }
 0x11a   : > { %2374 = vmatpush3.bf16.msra.mxu0 %v2570_v0  ;;  %2353 = vmatprep.subr.bf16.mxu1 %v2571_v1  ;;  %v2610_v0 = vld [vmem:[%s3191_s2 + $0x3a0] sm:$0xff]   ;;  %v2611_v1 = vld [vmem:[%s3191_s2 + $0x368] sm:$0xff]  }
 0x11b   : > { %2375 = vmatprep.subr.bf16.mxu0 %v2572_v2  ;;  %v2107_v2 = vld [vmem:[%s3190_s1 + $0x1f] ss:$0 sm:$0xff] }
 0x11d   : > { %2354 = vmatpush3.bf16.msra.mxu1 %v2573_v4  ;;  %v499_v4 = vadd.f32 %v2107_v2, %v494_v63 }
 0x11e   : > { %2376 = vmatpush3.bf16.msra.mxu0 %v2574_v5  ;;  %2355 = vmatprep.subr.bf16.mxu1 %v2575_v6  ;;  %v2613_v5 = vld [vmem:[%s3191_s2 + $0x328] sm:$0xff]  }
 0x11f   : > { %2377 = vmatprep.subr.bf16.mxu0 %v2576_v7  ;;  %v2614_v6 = vld [vmem:[%s3191_s2 + $0x3a8] sm:$0xff]   ;;  %v2615_v7 = vld [vmem:[%s3191_s2 + $0x370] sm:$0xff]  }
 0x121   : > { %2356 = vmatpush3.bf16.msra.mxu1 %v2577_v10  ;;  %v500_v10 = vmax.f32 %v499_v4, 0.0 }
 0x122   : > { %2378 = vmatpush3.bf16.msra.mxu0 %v2578_v13  ;;  %2357 = vmatprep.subr.bf16.mxu1 %v2579_v14  ;;  %v2619_v13 = vld [vmem:[%s3191_s2 + $0x378] sm:$0xff]  }
 0x123   : > { %2379 = vmatprep.subr.bf16.mxu0 %v2580_v15  ;;  %v2620_v14 = vld [vmem:[%s3191_s2 + $0x3f8] sm:$0xff]   ;;  %v541_v15 = vrot.slane %v500_v10, 2 }
 0x125   : > { %2358 = vmatpush3.bf16.msra.mxu1 %v2581_v20  ;;  %v561_v20 = vpack.c.bf16 %v541_v15, %v541_v15 }
 0x126   : > { %2380 = vmatpush3.bf16.msra.mxu0 %v2582_v22  ;;  %2359 = vmatprep.subr.bf16.mxu1 %v2583_v23  ;;  %v2624_v22 = vld [vmem:[%s3192_s3 + $0x8] sm:$0xff]   ;;  %v2625_v23 = vld [vmem:[%s3192_s3 + $0x10] sm:$0xff]  }
 0x127   : > { %2381 = vmatprep.subr.bf16.mxu0 %v2584_v24  ;;  %v2626_v24 = vld [vmem:[%s3192_s3 + $0x18] sm:$0xff]  }
 0x129   : > { %2360 = vmatpush3.bf16.msra.mxu1 %v2585_v27  ;;  %v2629_v27 = vld [vmem:[%s3192_s3 + $0x30] sm:$0xff]  }
 0x12a   : > { %2382 = vmatpush3.bf16.msra.mxu0 %v2586_v28  ;;  %2361 = vmatprep.subr.bf16.mxu1 %v2587_v29  ;;  %v2630_v28 = vld [vmem:[%s3192_s3 + $0x38] sm:$0xff]  }
 0x12b   : > { %2383 = vmatprep.subr.bf16.mxu0 %v2588_v30 }
 0x12d   : > { %2362 = vmatpush3.bf16.msra.mxu1 %v2589_v33 }
 0x12e   : > { %2384 = vmatpush3.bf16.msra.mxu0 %v2590_v34  ;;  %2391 = vmatprep.subr.bf16.mxu1 %v2591_v36 }
 0x12f   : > { %2413 = vmatprep.subr.bf16.mxu0 %v2592_v37 }
 0x130   : > { %1784 = vmatmul.mubr.bf16.vlgmr.msra.gmra.mrb[8].mxu1 %v555_v8 }
 0x131   : > { %1824 = vmatmul.mubr.bf16.vlgmr.msra.gmra.mrb[16].mxu0 %v557_v40  ;;  %2392 = vmatpush3.bf16.msra.mxu1 %v2593_v41 }
 0x132   : > { %2414 = vmatpush3.bf16.msra.mxu0 %v2594_v43  ;;  %2393 = vmatprep.subr.bf16.mxu1 %v2595_v44 }
 0x133   : > { %2415 = vmatprep.subr.bf16.mxu0 %v2596_v45  ;;  %1863 = vmatprep.mubr.bf16.mxu1 %v560_v46 }
 0x134   : > { %1903 = vmatprep.mubr.bf16.mxu0 %v562_v47 }
 0x135   : > { %2394 = vmatpush3.bf16.msra.mxu1 %v2597_v48 }
 0x136   : > { %2416 = vmatpush3.bf16.msra.mxu0 %v2598_v49  ;;  %2395 = vmatprep.subr.bf16.mxu1 %v2599_v50 }
 0x137   : > { %2417 = vmatprep.subr.bf16.mxu0 %v2600_v51 }
 0x139   : > { %2396 = vmatpush3.bf16.msra.mxu1 %v2601_v52 }
 0x13a   : > { %2418 = vmatpush3.bf16.msra.mxu0 %v2602_v53  ;;  %2397 = vmatprep.subr.bf16.mxu1 %v2603_v54 }
 0x13b   : > { %2419 = vmatprep.subr.bf16.mxu0 %v2604_v55 }
 0x13d   : > { %2398 = vmatpush3.bf16.msra.mxu1 %v2605_v56 }
 0x13e   : > { %2420 = vmatpush3.bf16.msra.mxu0 %v2606_v57  ;;  %2399 = vmatprep.subr.bf16.mxu1 %v2607_v58 }
 0x13f   : > { %2421 = vmatprep.subr.bf16.mxu0 %v2608_v61 }
 0x141   : > { %2400 = vmatpush3.bf16.msra.mxu1 %v2609_v62 }
 0x142   : > { %2422 = vmatpush3.bf16.msra.mxu0 %v2610_v0  ;;  %2401 = vmatprep.subr.bf16.mxu1 %v2611_v1 }
 0x143   : > { %2423 = vmatprep.subr.bf16.mxu0 %v2612_v3 }
 0x145   : > { %2402 = vmatpush3.bf16.msra.mxu1 %v2613_v5 }
 0x146   : > { %2424 = vmatpush3.bf16.msra.mxu0 %v2614_v6  ;;  %2403 = vmatprep.subr.bf16.mxu1 %v2615_v7 }
 0x147   : > { %2425 = vmatprep.subr.bf16.mxu0 %v2616_v9 }
 0x149   : > { %2404 = vmatpush3.bf16.msra.mxu1 %v2617_v11 }
 0x14a   : > { %2426 = vmatpush3.bf16.msra.mxu0 %v2618_v12  ;;  %2405 = vmatprep.subr.bf16.mxu1 %v2619_v13 }
 0x14b   : > { %2427 = vmatprep.subr.bf16.mxu0 %v2620_v14 }
 0x14d   : > { %2406 = vmatpush3.bf16.msra.mxu1 %v2621_v16  ;;  %v2239_v16 = vld [vmem:[%s3190_s1 + $0x22] ss:$0 sm:$0xff] }
 0x14e   : > { %2428 = vmatpush3.bf16.msra.mxu0 %v2622_v19  ;;  %2459 = vmatprep.subr.bf16.mxu1 %v2645_v18 }
 0x150   : > { %1864 = vmatmul.mubr.bf16.vlgmr.msra.gmra.mrb[12].mxu1 %v559_v21 }
 0x151   : > { %1904 = vmatmul.mubr.bf16.vlgmr.msra.gmra.mrb[20].mxu0 %v561_v20  ;;  %2475 = vmatprep.mubr.msk.bf16.mxu1 %vm2647_vm3, %v2645_v18 }
 0x152   : > { %2460 = vmatpush3.bf16.msra.mxu1 %v2623_v42 }
 0x153   : > { %2461 = vmatprep.subr.bf16.mxu1 %v2645_v18 }
 0x156   : > { %2462 = vmatpush3.bf16.msra.mxu1 %v2624_v22 }
 0x157   : > { %2463 = vmatprep.subr.bf16.mxu1 %v2645_v18 }
 0x15a   : > { %2464 = vmatpush3.bf16.msra.mxu1 %v2625_v23 }
 0x15b   : > { %2465 = vmatprep.subr.bf16.mxu1 %v2645_v18 }
 0x15e   : > { %2466 = vmatpush3.bf16.msra.mxu1 %v2626_v24 }
 0x15f   : > { %2467 = vmatprep.subr.bf16.mxu1 %v2645_v18 }
 0x162   : > { %2468 = vmatpush3.bf16.msra.mxu1 %v2627_v25 }
 0x163   : > { %2469 = vmatprep.subr.bf16.mxu1 %v2645_v18 }
 0x166   : > { %2470 = vmatpush3.bf16.msra.mxu1 %v2628_v26 }
 0x167   : > { %2471 = vmatprep.subr.bf16.mxu1 %v2645_v18 }
 0x16a   : > { %2472 = vmatpush3.bf16.msra.mxu1 %v2629_v27 }
 0x16b   : > { %2473 = vmatprep.subr.bf16.mxu1 %v2645_v18 }
 0x16e   : > { %2474 = vmatpush3.bf16.msra.mxu1 %v2630_v28 }
 0x1c3   : > { %v2275_v29 = vpop.f32.mrb[0].mxu1  ;;  %v2297_v30 = vpop.f32.mrb[8].mxu0 }
 0x1c4   : > { %v2276_v32 = vpop.f32.mrb[1].mxu1  ;;  %v2298_v33 = vpop.f32.mrb[9].mxu0 }
 0x1c5   : > { %v2277_v34 = vadd.f32 %v2276_v32, %v2275_v29  ;;  %v2299_v35 = vadd.f32 %v2298_v33, %v2297_v30  ;;  %v2278_v36 = vpop.f32.mrb[2].mxu1  ;;  %v2300_v37 = vpop.f32.mrb[10].mxu0 }
 0x1c6   : > { %v2279_v38 = vpop.f32.mrb[3].mxu1  ;;  %v2301_v39 = vpop.f32.mrb[11].mxu0 }
 0x1c7   : > { %v1626_v18 = vadd.f32 %v2277_v34, %v2110_v31 }
 0x1c9   : > { %v1666_v40 = vadd.f32 %v2299_v35, %v1626_v18 }
 0x1e3   : > { %v2319_v41 = vpop.f32.mrb[4].mxu1  ;;  %v2341_v8 = vpop.f32.mrb[12].mxu0 }
 0x1e4   : > { %v2320_v43 = vpop.f32.mrb[5].mxu1  ;;  %v2342_v44 = vpop.f32.mrb[13].mxu0 }
 0x1e5   : > { %v2321_v45 = vadd.f32 %v2320_v43, %v2319_v41  ;;  %v2343_v46 = vadd.f32 %v2342_v44, %v2341_v8  ;;  %v2322_v47 = vpop.f32.mrb[6].mxu1  ;;  %v2344_v48 = vpop.f32.mrb[14].mxu0 }
 0x1e6   : > { %v2323_v49 = vpop.f32.mrb[7].mxu1  ;;  %v2345_v50 = vpop.f32.mrb[15].mxu0 }
 0x1e7   : > { %v1706_v51 = vadd.f32 %v2321_v45, %v1666_v40 }
 0x1e9   : > { %v1746_v52 = vadd.f32 %v2343_v46, %v1706_v51 }
 0x203   : > { %v2363_v53 = vpop.f32.mrb[8].mxu1 }
 0x204   : > { %v2385_v54 = vpop.f32.mrb[16].mxu0  ;;  %v2364_v55 = vpop.f32.mrb[9].mxu1 }
 0x205   : > { %v2365_v56 = vadd.f32 %v2364_v55, %v2363_v53  ;;  %v2386_v57 = vpop.f32.mrb[17].mxu0  ;;  %v2366_v58 = vpop.f32.mrb[10].mxu1 }
 0x206   : > { %v2387_v59 = vadd.f32 %v2386_v57, %v2385_v54  ;;  %v2388_v60 = vpop.f32.mrb[18].mxu0  ;;  %v2367_v61 = vpop.f32.mrb[11].mxu1 }
 0x207   : > { %v1786_v62 = vadd.f32 %v2365_v56, %v1746_v52  ;;  %v2389_v63 = vpop.f32.mrb[19].mxu0 }
 0x209   : > { %v1826_v0 = vadd.f32 %v2387_v59, %v1786_v62 }
 0x223   : > { %v2407_v1 = vpop.f32.mrb[12].mxu1 }
 0x224   : > { %v2429_v2 = vpop.f32.mrb[20].mxu0  ;;  %v2408_v3 = vpop.f32.mrb[13].mxu1 }
 0x225   : > { %v2409_v4 = vadd.f32 %v2408_v3, %v2407_v1  ;;  %v2430_v5 = vpop.f32.mrb[21].mxu0  ;;  %v2410_v6 = vpop.f32.mrb[14].mxu1 }
 0x226   : > { %v2431_v7 = vadd.f32 %v2430_v5, %v2429_v2  ;;  %v2432_v9 = vpop.f32.mrb[22].mxu0  ;;  %v2411_v10 = vpop.f32.mrb[15].mxu1 }
 0x227   : > { %v1866_v11 = vadd.f32 %v2409_v4, %v1826_v0  ;;  %v2433_v12 = vpop.f32.mrb[23].mxu0 }
 0x229   : > { %v1906_v13 = vadd.f32 %v2431_v7, %v1866_v11 }
 0x22b   : > { %v1911_v14 = vmax.f32 %v1906_v13, 0.0 }
 0x22d   : > { %v1913_v15 = vpack.c.bf16 %v1911_v14, %v1911_v14 }
 0x22f   : > { %2476 = vmatmul.mubr.bf16.vlgmr.msra.gmra.mrb[16].mxu1 %v1913_v15 }
 0x302   : > { %v2016_v17 = vpop.f32.mrb[16].mxu1 }
 0x303   : > { %v2017_v19 = vadd.f32 %v2239_v16, %v2016_v17  ;;  %v2477_v20 = vpop.f32.mrb[17].mxu1 }
 0x304   : > { %v2019_v21 = vpop.f32.mrb[18].mxu1 }
 0x305   : > { %v2478_v42 = vpop.f32.mrb[19].mxu1  ;;  %v2023_v22 = vsel %vm2022_vm4, %v2017_v19, -inf }
 0x306   : > { %2024 = vmax.xlane.f32.xlu1 %v2023_v22 }
 0x393   : > { %v2025_v23 = vpop.xlane.xlu1 %2024 }
 0x394   : > { %v2026_v24 = vsub.f32 %v2017_v19, %v2025_v23 }
 0x396   : > { %v2027_v25 = vmul.f32 1.442695, %v2026_v24 }
 0x398   : > { %2631 = vpow2.f32 %v2027_v25 }
 0x3a2   : > { %v2632_v26 = vpop.eup %2631 }
 0x3a3   : > { %v2029_v27 = vsel %vm2022_vm4, %v2632_v26, 0.0 }
 0x3a4   : > { %2030 = vadd.xlane.f32.xlu0 %v2029_v27 }
 0x431   : > { %v2031_v28 = vpop.xlane.xlu0 %2030 }
 0x432   : > { %2633 = vrcp.f32 %v2031_v28 }
 0x43c   : > { %v2634_v29 = vpop.eup %2633 }
 0x43d   : > { %v2033_v30 = vmul.f32 %v2634_v29, %v2632_v26 }
 0x43f   : > { %2034 = vst [vmem:[%s195_s10] sm:$0x3] %v2033_v30 }
 0x440 PF: > { %s14_s15 = sadd.s32 1, %s2641_s15  }
 0x441   : > { %p11_p4 = scmp.ge.s32.totalorder %s14_s15, 10  }
 0x443   :  { %13 = sbr.rel (!%p11_p4) target bundleno = 1 (0x1), region = 66 }

</bundles_post_ra>
